<compile_context>
chip_gen: v6e
topology: v6e:2x2x1
jax: 0.10.0
libtpu: 0.0.40
codegen_flags: <defaults>
</compile_context>

<pallas_src>
from types import SimpleNamespace

import numpy as np
import jax
import jax.numpy as jnp
from jax.experimental import pallas as pl
from jax.experimental.pallas import tpu as pltpu

# ---------------- obstacle config (gmm) ----------------
_GMM_CENTERS = ((6.0, 6.0), (6.0, -6.0), (-6.0, -6.0))
_GMM_RADIUS = 1.5
_SP_THRESHOLD = 20.0


def _softplus(z, beta=1.0, threshold=20.0):
    """F.softplus semantics: linear above threshold (in beta*z)."""
    bz = beta * z
    return jnp.where(bz > threshold, z,
                     jnp.log1p(jnp.exp(jnp.minimum(bz, threshold))) / beta)


def _choose_layout(M):
    """Pick (TR, TC, R): tiles (TR, TC), canvas rows R (R % TR == 0)."""
    if M >= 2 * 128 * 512:
        TR, TC = 128, 512          # 4-plane input block = 1 MiB, out = 256 KiB
    elif M >= 2 * 8 * 512:
        TR, TC = 8, 512
    else:
        TR, TC = 8, 128            # minimal dense tile for tiny inputs
    n_tiles = pl.cdiv(M, TR * TC)
    R = n_tiles * TR
    return TR, TC, R


def _make_kernel(obs_w, cgst_w):
    obs_w = float(obs_w)
    cgst_w = float(cgst_w)

    def kernel(p_ref, out_ref):
        # p_ref block: (4, TR, TC) planes = [x, y, partner_x, partner_y]
        x = p_ref[0]
        y = p_ref[1]
        px = p_ref[2]
        py = p_ref[3]

        # --- obstacle_cost_gmm: sum_i softplus(100*(r - ||p - c_i||)) ---
        # centers are (6,6), (6,-6), (-6,-6): reuse the four shifted squares.
        xm = x - 6.0
        xp = x + 6.0
        ym = y - 6.0
        yp = y + 6.0
        xm2 = xm * xm
        xp2 = xp * xp
        ym2 = ym * ym
        yp2 = yp * yp

        # merged softplus: sum_i [z_i]_{z_i>thr} + log(prod_i (1 + exp(z_i))_{z_i<=thr})
        lin = jnp.zeros_like(x)
        prod = jnp.ones_like(x)
        for d2 in (xm2 + ym2, xm2 + yp2, xp2 + yp2):
            dist = jnp.sqrt(d2)
            z = 100.0 * (_GMM_RADIUS - dist)
            e = jnp.exp(jnp.minimum(z, _SP_THRESHOLD))
            over = z > _SP_THRESHOLD
            lin = lin + jnp.where(over, z, 0.0)
            prod = prod * jnp.where(over, 1.0, 1.0 + e)
        cost_obs = lin + jnp.log(prod)          # single log for all 3 centers

        # --- congestion_cost: 2 / (||xt - yt||^2 + 1) ---
        ddx = x - px
        ddy = y - py
        cong = 2.0 / (ddx * ddx + ddy * ddy + 1.0)

        out_ref[...] = obs_w * cost_obs + cgst_w * cong

    return kernel


class CrowdNavStateCostPallas:
    """Pallas port of CrowdNavStateCost(name='gmm', scfg)."""

    def __init__(self, name, scfg):
        assert name == "gmm", "this synthetic port bakes in the 'gmm' obstacle cost"
        self.scfg = scfg
        assert "obs" in scfg.type and scfg.obs > 0
        self._use_cgst = ("ent" not in scfg.type or not scfg.ent > 0) and \
                         ("cgst" in scfg.type and scfg.cgst > 0)
        assert self._use_cgst, "this port implements the 'obs'+'cgst' configuration"
        self._kernel = _make_kernel(scfg.obs, scfg.cgst)

    def __call__(self, xt, t, gpath=None, *, key):
        """
        xt: (*, T, D=2)  float32
        t:  (T,)
        returns cost: (*, T)
        """
        T, D = xt.shape[-2:]
        assert t.shape == (T,) and D == 2
        xt = xt.astype(jnp.float32)
        lead_shape = xt.shape[:-1]                       # (*, T)
        B_flat = int(np.prod(xt.shape[:-2])) if xt.ndim > 2 else 1
        M = B_flat * T

        # single relayout pass: points-on-lanes planar coords (2, M)
        x2 = xt.reshape(M, D).T                          # (2, M)

        # congestion partner via ONE lane-axis gather on the planar layout:
        # point m = (b, t) pairs with point perm[b]*T + t
        perm = jax.random.permutation(key, B_flat)
        idx = (perm[:, None] * T
               + jnp.arange(T, dtype=perm.dtype)[None, :]).reshape(-1)
        y2 = jnp.take(x2, idx, axis=1)                   # (2, M)

        # stack + pad once, reshape to the sublane-dense (4, R, TC) canvas
        TR, TC, R = _choose_layout(M)
        M_pad = R * TC
        planes = jnp.concatenate([x2, y2], axis=0)       # (4, M)
        planes = jnp.pad(planes, ((0, 0), (0, M_pad - M)))
        planes = planes.reshape(4, R, TC)

        grid = (R // TR,)
        out = pl.pallas_call(
            self._kernel,
            out_shape=jax.ShapeDtypeStruct((R, TC), jnp.float32),
            grid=grid,
            in_specs=[pl.BlockSpec((4, TR, TC), lambda i: (0, i, 0))],
            out_specs=pl.BlockSpec((TR, TC), lambda i: (i, 0)),
            compiler_params=pltpu.CompilerParams(
                dimension_semantics=("parallel",)),
        )(planes)

        return out.reshape(M_pad)[:M].reshape(lead_shape)


# ---------------- pure-JAX reference (mirrors the torch code) ----------------
def _reference(xt, key, obs_w, cgst_w):
    x, y = xt[..., 0], xt[..., 1]
    cost = jnp.zeros_like(x)
    for cx, cy in _GMM_CENTERS:
        dist = jnp.sqrt((x - cx) ** 2 + (y - cy) ** 2)
        cost = cost + _softplus(100.0 * (_GMM_RADIUS - dist))

    T, D = xt.shape[-2:]
    flat = xt.reshape(-1, T, D)
    perm = jax.random.permutation(key, flat.shape[0])
    yt = flat[perm].reshape(xt.shape)
    dd = xt - yt
    sqdist = jnp.sum(dd * dd, axis=-1)
    cong = 2.0 / (sqdist + 1.0)
    return obs_w * cost + cgst_w * cong


if __name__ == "__main__":
    B, N, T, D = 2, 8, 8, 2
    key = jax.random.PRNGKey(0)
    k_x, k_perm = jax.random.split(key)

    xt = (jax.random.normal(k_x, (B, N, T, D), jnp.float32) * 4.0)
    t = jnp.linspace(0.0, 1.0, T, dtype=jnp.float32)

    scfg = SimpleNamespace(type="obs,cgst", obs=2.0, cgst=1.0, ent=0.0)
    model = CrowdNavStateCostPallas("gmm", scfg)

    V = model(xt, t, gpath=None, key=k_perm)
    V = jax.block_until_ready(V)
    assert V.shape == (B, N, T)

    V_ref = _reference(xt, k_perm, scfg.obs, scfg.cgst)
    np.testing.assert_allclose(np.asarray(V), np.asarray(V_ref),
                               rtol=1e-5, atol=1e-5)
    print("KERNEL_OK")
</pallas_src>

<mosaic_0001>
module attributes {stable_mosaic.version = 11 : i64} {
  func.func @kernel(%arg0: i32, %arg1: memref<4x8x128xf32, #tpu.memory_space<vmem>>, %arg2: memref<8x128xf32, #tpu.memory_space<vmem>>) attributes {dimension_semantics = [#tpu.dimension_semantics<parallel>], iteration_bounds = array<i64: 1>, scalar_prefetch = 0 : i64, scratch_operands = 0 : i64, tpu.core_type = #tpu.core_type<tc>, window_params = [{transform_indices = @transform_0, window_bounds = array<i64: 4, 8, 128>}, {transform_indices = @transform_1, window_bounds = array<i64: 8, 128>}]} {
    %c0 = arith.constant 0 : index
    %c0_0 = arith.constant 0 : index
    %c0_1 = arith.constant 0 : index
    %0 = vector.load %arg1[%c0, %c0_0, %c0_1] : memref<4x8x128xf32, #tpu.memory_space<vmem>>, vector<1x8x128xf32>
    %1 = vector.shape_cast %0 : vector<1x8x128xf32> to vector<8x128xf32>
    %c1 = arith.constant 1 : index
    %c0_2 = arith.constant 0 : index
    %c0_3 = arith.constant 0 : index
    %2 = vector.load %arg1[%c1, %c0_2, %c0_3] : memref<4x8x128xf32, #tpu.memory_space<vmem>>, vector<1x8x128xf32>
    %3 = vector.shape_cast %2 : vector<1x8x128xf32> to vector<8x128xf32>
    %c2 = arith.constant 2 : index
    %c0_4 = arith.constant 0 : index
    %c0_5 = arith.constant 0 : index
    %4 = vector.load %arg1[%c2, %c0_4, %c0_5] : memref<4x8x128xf32, #tpu.memory_space<vmem>>, vector<1x8x128xf32>
    %5 = vector.shape_cast %4 : vector<1x8x128xf32> to vector<8x128xf32>
    %c3 = arith.constant 3 : index
    %c0_6 = arith.constant 0 : index
    %c0_7 = arith.constant 0 : index
    %6 = vector.load %arg1[%c3, %c0_6, %c0_7] : memref<4x8x128xf32, #tpu.memory_space<vmem>>, vector<1x8x128xf32>
    %7 = vector.shape_cast %6 : vector<1x8x128xf32> to vector<8x128xf32>
    %cst = arith.constant 6.000000e+00 : f32
    %8 = vector.broadcast %cst : f32 to vector<8x128xf32>
    %9 = arith.subf %1, %8 : vector<8x128xf32>
    %cst_8 = arith.constant 6.000000e+00 : f32
    %10 = vector.broadcast %cst_8 : f32 to vector<8x128xf32>
    %11 = arith.addf %1, %10 : vector<8x128xf32>
    %cst_9 = arith.constant 6.000000e+00 : f32
    %12 = vector.broadcast %cst_9 : f32 to vector<8x128xf32>
    %13 = arith.subf %3, %12 : vector<8x128xf32>
    %cst_10 = arith.constant 6.000000e+00 : f32
    %14 = vector.broadcast %cst_10 : f32 to vector<8x128xf32>
    %15 = arith.addf %3, %14 : vector<8x128xf32>
    %16 = arith.mulf %9, %9 : vector<8x128xf32>
    %17 = arith.mulf %11, %11 : vector<8x128xf32>
    %18 = arith.mulf %13, %13 : vector<8x128xf32>
    %19 = arith.mulf %15, %15 : vector<8x128xf32>
    %cst_11 = arith.constant 0.000000e+00 : f32
    %20 = vector.broadcast %cst_11 : f32 to vector<8x128xf32>
    %cst_12 = arith.constant 1.000000e+00 : f32
    %21 = vector.broadcast %cst_12 : f32 to vector<8x128xf32>
    %22 = arith.addf %16, %18 : vector<8x128xf32>
    %23 = arith.addf %16, %19 : vector<8x128xf32>
    %24 = arith.addf %17, %19 : vector<8x128xf32>
    %25 = math.sqrt %22 : vector<8x128xf32>
    %cst_13 = arith.constant 1.500000e+00 : f32
    %26 = vector.broadcast %cst_13 : f32 to vector<8x128xf32>
    %27 = arith.subf %26, %25 : vector<8x128xf32>
    %cst_14 = arith.constant 1.000000e+02 : f32
    %28 = vector.broadcast %cst_14 : f32 to vector<8x128xf32>
    %29 = arith.mulf %28, %27 : vector<8x128xf32>
    %cst_15 = arith.constant 2.000000e+01 : f32
    %30 = vector.broadcast %cst_15 : f32 to vector<8x128xf32>
    %31 = arith.minimumf %29, %30 : vector<8x128xf32>
    %32 = math.exp %31 : vector<8x128xf32>
    %cst_16 = arith.constant 2.000000e+01 : f32
    %33 = vector.broadcast %cst_16 : f32 to vector<8x128xf32>
    %34 = arith.cmpf ogt, %29, %33 : vector<8x128xf32>
    %cst_17 = arith.constant 0.000000e+00 : f32
    %35 = vector.broadcast %cst_17 : f32 to vector<8x128xf32>
    %36 = arith.select %34, %29, %35 : vector<8x128xi1>, vector<8x128xf32>
    %37 = arith.addf %20, %36 : vector<8x128xf32>
    %cst_18 = arith.constant 1.000000e+00 : f32
    %38 = vector.broadcast %cst_18 : f32 to vector<8x128xf32>
    %39 = arith.addf %38, %32 : vector<8x128xf32>
    %cst_19 = arith.constant 1.000000e+00 : f32
    %40 = vector.broadcast %cst_19 : f32 to vector<8x128xf32>
    %41 = arith.select %34, %40, %39 : vector<8x128xi1>, vector<8x128xf32>
    %42 = arith.mulf %21, %41 : vector<8x128xf32>
    %43 = math.sqrt %23 : vector<8x128xf32>
    %cst_20 = arith.constant 1.500000e+00 : f32
    %44 = vector.broadcast %cst_20 : f32 to vector<8x128xf32>
    %45 = arith.subf %44, %43 : vector<8x128xf32>
    %cst_21 = arith.constant 1.000000e+02 : f32
    %46 = vector.broadcast %cst_21 : f32 to vector<8x128xf32>
    %47 = arith.mulf %46, %45 : vector<8x128xf32>
    %cst_22 = arith.constant 2.000000e+01 : f32
    %48 = vector.broadcast %cst_22 : f32 to vector<8x128xf32>
    %49 = arith.minimumf %47, %48 : vector<8x128xf32>
    %50 = math.exp %49 : vector<8x128xf32>
    %cst_23 = arith.constant 2.000000e+01 : f32
    %51 = vector.broadcast %cst_23 : f32 to vector<8x128xf32>
    %52 = arith.cmpf ogt, %47, %51 : vector<8x128xf32>
    %cst_24 = arith.constant 0.000000e+00 : f32
    %53 = vector.broadcast %cst_24 : f32 to vector<8x128xf32>
    %54 = arith.select %52, %47, %53 : vector<8x128xi1>, vector<8x128xf32>
    %55 = arith.addf %37, %54 : vector<8x128xf32>
    %cst_25 = arith.constant 1.000000e+00 : f32
    %56 = vector.broadcast %cst_25 : f32 to vector<8x128xf32>
    %57 = arith.addf %56, %50 : vector<8x128xf32>
    %cst_26 = arith.constant 1.000000e+00 : f32
    %58 = vector.broadcast %cst_26 : f32 to vector<8x128xf32>
    %59 = arith.select %52, %58, %57 : vector<8x128xi1>, vector<8x128xf32>
    %60 = arith.mulf %42, %59 : vector<8x128xf32>
    %61 = math.sqrt %24 : vector<8x128xf32>
    %cst_27 = arith.constant 1.500000e+00 : f32
    %62 = vector.broadcast %cst_27 : f32 to vector<8x128xf32>
    %63 = arith.subf %62, %61 : vector<8x128xf32>
    %cst_28 = arith.constant 1.000000e+02 : f32
    %64 = vector.broadcast %cst_28 : f32 to vector<8x128xf32>
    %65 = arith.mulf %64, %63 : vector<8x128xf32>
    %cst_29 = arith.constant 2.000000e+01 : f32
    %66 = vector.broadcast %cst_29 : f32 to vector<8x128xf32>
    %67 = arith.minimumf %65, %66 : vector<8x128xf32>
    %68 = math.exp %67 : vector<8x128xf32>
    %cst_30 = arith.constant 2.000000e+01 : f32
    %69 = vector.broadcast %cst_30 : f32 to vector<8x128xf32>
    %70 = arith.cmpf ogt, %65, %69 : vector<8x128xf32>
    %cst_31 = arith.constant 0.000000e+00 : f32
    %71 = vector.broadcast %cst_31 : f32 to vector<8x128xf32>
    %72 = arith.select %70, %65, %71 : vector<8x128xi1>, vector<8x128xf32>
    %73 = arith.addf %55, %72 : vector<8x128xf32>
    %cst_32 = arith.constant 1.000000e+00 : f32
    %74 = vector.broadcast %cst_32 : f32 to vector<8x128xf32>
    %75 = arith.addf %74, %68 : vector<8x128xf32>
    %cst_33 = arith.constant 1.000000e+00 : f32
    %76 = vector.broadcast %cst_33 : f32 to vector<8x128xf32>
    %77 = arith.select %70, %76, %75 : vector<8x128xi1>, vector<8x128xf32>
    %78 = arith.mulf %60, %77 : vector<8x128xf32>
    %79 = math.log %78 : vector<8x128xf32>
    %80 = arith.addf %73, %79 : vector<8x128xf32>
    %81 = arith.subf %1, %5 : vector<8x128xf32>
    %82 = arith.subf %3, %7 : vector<8x128xf32>
    %83 = arith.mulf %81, %81 : vector<8x128xf32>
    %84 = arith.mulf %82, %82 : vector<8x128xf32>
    %85 = arith.addf %83, %84 : vector<8x128xf32>
    %cst_34 = arith.constant 1.000000e+00 : f32
    %86 = vector.broadcast %cst_34 : f32 to vector<8x128xf32>
    %87 = arith.addf %85, %86 : vector<8x128xf32>
    %cst_35 = arith.constant 2.000000e+00 : f32
    %88 = vector.broadcast %cst_35 : f32 to vector<8x128xf32>
    %89 = arith.divf %88, %87 : vector<8x128xf32>
    %cst_36 = arith.constant 2.000000e+00 : f32
    %90 = vector.broadcast %cst_36 : f32 to vector<8x128xf32>
    %91 = arith.mulf %90, %80 : vector<8x128xf32>
    %cst_37 = arith.constant 1.000000e+00 : f32
    %92 = vector.broadcast %cst_37 : f32 to vector<8x128xf32>
    %93 = arith.mulf %92, %89 : vector<8x128xf32>
    %94 = arith.addf %91, %93 : vector<8x128xf32>
    %c0_38 = arith.constant 0 : index
    %c0_39 = arith.constant 0 : index
    %95 = vector.load %arg2[%c0_38, %c0_39] : memref<8x128xf32, #tpu.memory_space<vmem>>, vector<8x128xf32>
    tpu.vector_store %arg2[%c0_38, %c0_39], %94 {strides = array<i32>} : memref<8x128xf32, #tpu.memory_space<vmem>>, vector<8x128xf32>,
    return
  }
  func.func @transform_0(%arg0: i32) -> (i32, i32, i32) {
    %c0_i32 = arith.constant 0 : i32
    %c0_i32_0 = arith.constant 0 : i32
    %c0_i32_1 = arith.constant 0 : i32
    return %c0_i32, %arg0, %c0_i32_0 : i32, i32, i32
  }
  func.func @transform_1(%arg0: i32) -> (i32, i32) {
    %c0_i32 = arith.constant 0 : i32
    %c0_i32_0 = arith.constant 0 : i32
    return %arg0, %c0_i32 : i32, i32
  }
}

</mosaic_0001>

<bundles_post_ra>
// kernel: tpu_custom_call.1
= control target key start
LH: loop header
LB: loop body
LE: loop exit
PB: predicated region body
PF: predicated region fallthrough
CT: control target
= control target key end

     0   :  { %6 = vsyncpa [#allocation3], 0  ;;  %s211_s0 = inlined_call_operand.hbm [shape: f32[4,8,128], index: 0, kind: input, shape index: {}]   ;;  %s212_s1 = inlined_call_operand.hbm [shape: f32[8,128], index: 1, kind: output, shape index: {}]  }
   0x1   :  { %7 = vsyncpa [#allocation4], 0  ;;  %s189_s6 = smov [#allocation2]  }
   0x2   :  { %s13_s7 = sshll.u32 %s189_s6, 4  ;;  %s14_s7 = int_to_ptr.vmem [resolvable:$true] %s13_s7 }
   0x3   :  { %s153_s8 = scalar_lea.vmem %s14_s7, 512  ;;  %p158_p1 = scmp.lt.s32.totalorder %s14_s7, %s14_s7 }
   0x4   :  { %p154_p0 = scmp.ne.s32.totalorder %s14_s7, %s153_s8  ;;  %p159_p2 = scmp.lt.s32.totalorder %s153_s8, %s153_s8 }
   0x6   :  { %p160_p3 = por %p159_p2, %p158_p1 }
   0x8   :  { %p161_p4 = pnand %p160_p3, %p154_p0 }
   0xa   :  { %164 = shalt.err (!%p161_p4)
}
   0xb   :  { %s190_s9 = smov 128   ;;  %s191_s10 = smov 8  }
   0xc   :  { %19 = dma.hbm_to_vmem [thread:$0]  %s211_s0, 512, %s14_s7, [#allocation3], %s190_s9, %s190_s9, %s191_s10  }
   0xd   :  { %185 = dma.done.wait [#allocation3], 512  }
   0xe   :  { %186 = vsyncadd [#allocation3], 4294966784  ;;  %v23_v0 = vld [vmem:[#allocation2] sm:$0xff]  ;;  %v25_v1 = vld [vmem:[#allocation2 + $0x8] sm:$0xff]  ;;  %s192_s0 = smov [#allocation5]  }
   0xf   :  { %v123_v2 = vadd.f32 -6.0, %v23_v0  ;;  %v31_v3 = vadd.f32 6.0, %v23_v0  ;;  %v124_v4 = vadd.f32 -6.0, %v25_v1  ;;  %v33_v5 = vadd.f32 6.0, %v25_v1  ;;  %v27_v40 = vld [vmem:[#allocation2 + $0x10] sm:$0xff]  ;;  %v29_v41 = vld [vmem:[#allocation2 + $0x18] sm:$0xff] }
  0x10   :  { %v97_v42 = vsub.f32 %v23_v0, %v27_v40  ;;  %v98_v43 = vsub.f32 %v25_v1, %v29_v41  ;;  %s114_s13 = sshll.u32 %s192_s0, 4  ;;  %s115_s13 = int_to_ptr.vmem [resolvable:$true] %s114_s13 }
  0x11   :  { %v34_v6 = vmul.f32 %v123_v2, %v123_v2  ;;  %v35_v7 = vmul.f32 %v31_v3, %v31_v3  ;;  %v36_v8 = vmul.f32 %v124_v4, %v124_v4  ;;  %v37_v9 = vmul.f32 %v33_v5, %v33_v5  ;;  %s165_s14 = scalar_lea.vmem %s115_s13, 128  ;;  %p170_p6 = scmp.lt.s32.totalorder %s115_s13, %s115_s13 }
  0x12   :  { %v99_v44 = vmul.f32 %v97_v42, %v97_v42  ;;  %v100_v45 = vmul.f32 %v98_v43, %v98_v43  ;;  %p166_p5 = scmp.ne.s32.totalorder %s115_s13, %s165_s14  ;;  %p171_p7 = scmp.lt.s32.totalorder %s165_s14, %s165_s14 }
  0x13   :  { %v38_v10 = vadd.f32 %v36_v8, %v34_v6  ;;  %v39_v11 = vadd.f32 %v37_v9, %v34_v6  ;;  %v40_v12 = vadd.f32 %v37_v9, %v35_v7 }
  0x14   :  { %v101_v47 = vadd.f32 %v100_v45, %v99_v44  ;;  %p172_p8 = por %p171_p7, %p170_p6 }
  0x15   :  { %129 = vrsqrt.f32 %v38_v10  ;;  %vm43_vm0 = vcmp.eq.f32.partialorder %v38_v10, inf  ;;  %v46_v14 = vand.u32 2147483648, %v38_v10  ;;  %vm45_vm1 = vcmp.eq.f32.partialorder %v38_v10, 0.0 }
  0x16   :  { %131 = vrsqrt.f32 %v39_v11  ;;  %vm60_vm2 = vcmp.eq.f32.partialorder %v39_v11, inf  ;;  %v63_v17 = vand.u32 2147483648, %v39_v11  ;;  %vm62_vm3 = vcmp.eq.f32.partialorder %v39_v11, 0.0  ;;  %p173_p9 = pnand %p172_p8, %p166_p5 }
  0x17   :  { %133 = vrsqrt.f32 %v40_v12  ;;  %vm78_vm4 = vcmp.eq.f32.partialorder %v40_v12, inf  ;;  %v81_v20 = vand.u32 2147483648, %v40_v12  ;;  %vm80_vm5 = vcmp.eq.f32.partialorder %v40_v12, 0.0 }
  0x18   :  { %v102_v55 = vadd.f32 1.0, %v101_v47 }
  0x22   :  { %v130_v13 = vpop.eup %129 }
  0x23   :  { %v132_v15 = vpop.eup %131  ;;  %v42_v16 = vmul.f32 %v130_v13, %v38_v10 }
  0x24   :  { %v134_v18 = vpop.eup %133  ;;  %v59_v19 = vmul.f32 %v132_v15, %v39_v11 }
  0x25   :  { %v44_v21 = vsel %vm43_vm0, %v38_v10, %v42_v16  ;;  %v77_v22 = vmul.f32 %v134_v18, %v40_v12 }
  0x26   :  { %v47_v23 = vsel %vm45_vm1, %v46_v14, %v44_v21  ;;  %v61_v24 = vsel %vm60_vm2, %v39_v11, %v59_v19 }
  0x27   :  { %v48_v25 = vsub.f32 1.5, %v47_v23  ;;  %v64_v26 = vsel %vm62_vm3, %v63_v17, %v61_v24  ;;  %v79_v27 = vsel %vm78_vm4, %v40_v12, %v77_v22 }
  0x28   :  { %v65_v28 = vsub.f32 1.5, %v64_v26  ;;  %v82_v29 = vsel %vm80_vm5, %v81_v20, %v79_v27 }
  0x29   :  { %v49_v30 = vmul.f32 100.0, %v48_v25  ;;  %v83_v31 = vsub.f32 1.5, %v82_v29 }
  0x2a   :  { %v66_v32 = vmul.f32 100.0, %v65_v28 }
  0x2b   :  { %v50_v33 = vmin.f32 %v49_v30, 20.0  ;;  %v84_v34 = vmul.f32 100.0, %v83_v31  ;;  %vm53_vm6 = vcmp.gt.f32.partialorder %v49_v30, 20.0 }
  0x2c   :  { %v67_v35 = vmin.f32 %v66_v32, 20.0  ;;  %vm70_vm7 = vcmp.gt.f32.partialorder %v66_v32, 20.0  ;;  %v54_v59 = vsel %vm53_vm6, %v49_v30, 0.0 }
  0x2d   :  { %v51_v36 = vmul.f32 1.442695, %v50_v33  ;;  %v85_v37 = vmin.f32 %v84_v34, 20.0  ;;  %vm88_vm8 = vcmp.gt.f32.partialorder %v84_v34, 20.0  ;;  %v71_v60 = vsel %vm70_vm7, %v66_v32, 0.0 }
  0x2e   :  { %v68_v38 = vmul.f32 1.442695, %v67_v35  ;;  %v72_v61 = vadd.f32 %v71_v60, %v54_v59  ;;  %v89_v62 = vsel %vm88_vm8, %v84_v34, 0.0 }
  0x2f   :  { %135 = vpow2.f32 %v51_v36  ;;  %v86_v39 = vmul.f32 1.442695, %v85_v37 }
  0x30   :  { %137 = vpow2.f32 %v68_v38  ;;  %v90_v0 = vadd.f32 %v89_v62, %v72_v61 }
  0x31   :  { %139 = vpow2.f32 %v86_v39 }
  0x32   :  { %141 = vrcp.f32 %v102_v55 }
  0x3c   :  { %v136_v46 = vpop.eup %135 }
  0x3d   :  { %v138_v48 = vpop.eup %137  ;;  %v56_v49 = vadd.f32 1.0, %v136_v46 }
  0x3e   :  { %v140_v50 = vpop.eup %139  ;;  %v73_v51 = vadd.f32 1.0, %v138_v48 }
  0x3f   :  { %v57_v52 = vsel %vm53_vm6, 1.0, %v56_v49  ;;  %v91_v53 = vadd.f32 1.0, %v140_v50  ;;  %v142_v63 = vpop.eup %141 }
  0x40   :  { %v74_v54 = vsel %vm70_vm7, 1.0, %v73_v51  ;;  %v104_v4 = vmul.f32 2.0, %v142_v63 }
  0x41   :  { %v75_v56 = vmul.f32 %v74_v54, %v57_v52  ;;  %v92_v57 = vsel %vm88_vm8, 1.0, %v91_v53 }
  0x43   :  { %v93_v58 = vmul.f32 %v92_v57, %v75_v56 }
  0x45   :  { %143 = vlog2.f32 %v93_v58 }
  0x52   :  { %v144_v1 = vpop.eup %143 }
  0x53   :  { %v95_v2 = vmul.f32 0.6931472, %v144_v1 }
  0x55   :  { %v96_v3 = vadd.f32 %v95_v2, %v90_v0 }
  0x57   :  { %v105_v5 = vmul.f32 2.0, %v96_v3 }
  0x59   :  { %v106_v6 = vadd.f32 %v105_v5, %v104_v4 }
  0x5b   :  { %107 = vst [vmem:[#allocation5] sm:$0xff] %v106_v6 }
  0x5c   :  { %176 = shalt.err (!%p173_p9)
}
  0x5d   :  { %117 = dma.vmem_to_hbm [thread:$0]  %s115_s13, 128, %s212_s1, [#allocation4]  }
  0x5e   :  { %187 = dma.done.wait [#allocation4], 128  }
  0x5f   :  { %188 = vsyncadd [#allocation4], 4294967168 }
  0x60   :  { %121 = vsyncpa [#allocation3], 1 }
  0x61   :  { %122 = vsyncpa [#allocation4], 1 }

</bundles_post_ra>
